<compile_context>
chip_gen: v7x
topology: tpu7x:2x2x1
jax: 0.10.0
libtpu: 0.0.40
codegen_flags: <defaults>
</compile_context>

<pallas_src>
import numpy as np

import jax
import jax.numpy as jnp
from jax.experimental import pallas as pl
from jax.experimental.pallas import tpu as pltpu

LANE = 128


def timenet_kernel(t_ref, w1_ref, b1_ref, w2_ref, b2_ref, o_ref):
    # fc1 + ReLU: input_dim == 1 -> pure VPU broadcast multiply-add.
    t = t_ref[...]                                           # (tile_b, 1) f32
    h = jnp.maximum(t * w1_ref[...] + b1_ref[...], 0.0)     # (tile_b, Hp) f32
    # fc2 + ReLU: lane-dense (Hp x Op) = 128x128 MXU matmul, f32 accumulation.
    y = jnp.dot(h.astype(w2_ref.dtype), w2_ref[...],
                preferred_element_type=jnp.float32)          # (tile_b, Op) f32
    y = jnp.maximum(y + b2_ref[...], 0.0)
    # Store only the real output lanes; the Op padding never leaves VMEM/vregs.
    o = o_ref.shape[-1]
    o_ref[...] = y[:, :o].astype(o_ref.dtype)


def prepare_timenet_params(w1, b1, w2, b2, *, matmul_dtype=jnp.float32):
    """One-time padding/cast of the tiny weights to 128-lane tiles.

    Call once and reuse the result; keeps each forward down to a single
    pallas_call (no per-call XLA pad/scatter kernels). matmul_dtype=bf16
    halves w2 DMA/VMEM on any generation (elementwise math stays f32) but
    loosens the f32 tolerance.
    """
    H = w1.shape[-1]
    O = w2.shape[-1]
    Hp = pl.cdiv(H, LANE) * LANE
    Op = pl.cdiv(O, LANE) * LANE
    w1p = jnp.zeros((1, Hp), jnp.float32).at[:, :H].set(
        jnp.asarray(w1, jnp.float32).reshape(1, H))
    b1p = jnp.zeros((1, Hp), jnp.float32).at[:, :H].set(
        jnp.asarray(b1, jnp.float32).reshape(1, H))
    w2p = jnp.zeros((Hp, Op), jnp.float32).at[:H, :O].set(
        jnp.asarray(w2, jnp.float32))
    b2p = jnp.zeros((1, Op), jnp.float32).at[:, :O].set(
        jnp.asarray(b2, jnp.float32).reshape(1, O))
    w2p = w2p.astype(matmul_dtype)
    return (w1p, b1p, w2p, b2p), O


def timenet_forward(t, padded_params, output_dim, *, tile_b=1024, out_dtype=None):
    """t: (B, 1) f32 -> (B, output_dim)."""
    w1p, b1p, w2p, b2p = padded_params
    B, in_dim = t.shape
    assert in_dim == 1, "TimeNet takes a (batch, 1) time input"
    Hp = w1p.shape[-1]
    Op = w2p.shape[-1]
    O = output_dim
    out_dtype = t.dtype if out_dtype is None else out_dtype

    # Clamp the batch tile: multiple of 8 sublanes, and aim for >= 2 grid steps
    # so v7x's two TensorCores both get work on the "parallel" axis.
    tb = min(int(tile_b), max(8, pl.cdiv(pl.cdiv(B, 2), 8) * 8))
    assert tb % 8 == 0
    grid = (pl.cdiv(B, tb),)   # partial last block handled by Pallas masking

    bytes_accessed = (
        B * in_dim * np.dtype(t.dtype).itemsize
        + B * O * np.dtype(out_dtype).itemsize
        + w1p.size * np.dtype(w1p.dtype).itemsize
        + b1p.size * np.dtype(b1p.dtype).itemsize
        + w2p.size * np.dtype(w2p.dtype).itemsize
        + b2p.size * np.dtype(b2p.dtype).itemsize)
    cost = pl.CostEstimate(flops=2 * B * Hp * Op + 4 * B * Hp,
                           transcendentals=0,
                           bytes_accessed=bytes_accessed)

    return pl.pallas_call(
        timenet_kernel,
        out_shape=jax.ShapeDtypeStruct((B, O), out_dtype),
        grid_spec=pltpu.PrefetchScalarGridSpec(
            num_scalar_prefetch=0,
            grid=grid,
            in_specs=[
                # streamed batch tile of the time input
                pl.BlockSpec((tb, 1), lambda i: (i, 0)),
                # weights / biases: constant block index -> held resident,
                # not re-DMA'd per grid step.
                pl.BlockSpec((1, Hp), lambda i: (0, 0)),
                pl.BlockSpec((1, Hp), lambda i: (0, 0)),
                pl.BlockSpec((Hp, Op), lambda i: (0, 0)),
                pl.BlockSpec((1, Op), lambda i: (0, 0)),
            ],
            # Last dim 16 == full array dim -> legal block; stores only the
            # real 16 lanes to HBM (1/8 the bytes of the padded version).
            out_specs=pl.BlockSpec((tb, O), lambda i: (i, 0)),
        ),
        compiler_params=pltpu.CompilerParams(
            dimension_semantics=("parallel",)),
        cost_estimate=cost,
    )(t, w1p, b1p, w2p, b2p)


def init_params(key, input_dim=1, hidden_dim=32, output_dim=16):
    """Deterministic init mimicking nn.Linear's uniform(-1/sqrt(fan_in), ...)."""
    k1, k2, k3, k4 = jax.random.split(key, 4)
    bound1 = 1.0 / jnp.sqrt(input_dim)
    bound2 = 1.0 / jnp.sqrt(hidden_dim)
    # stored already transposed relative to nn.Linear: (in_features, out_features)
    w1 = jax.random.uniform(k1, (input_dim, hidden_dim), jnp.float32, -bound1, bound1)
    b1 = jax.random.uniform(k2, (hidden_dim,), jnp.float32, -bound1, bound1)
    w2 = jax.random.uniform(k3, (hidden_dim, output_dim), jnp.float32, -bound2, bound2)
    b2 = jax.random.uniform(k4, (output_dim,), jnp.float32, -bound2, bound2)
    return w1, b1, w2, b2


if __name__ == "__main__":
    key = jax.random.PRNGKey(0)
    kx, kp = jax.random.split(key)

    input_dim, hidden_dim, output_dim = 1, 32, 16
    batch = 300   # not a multiple of the tile -> exercises the partial last block

    t = jax.random.normal(kx, (batch, input_dim), jnp.float32)
    w1, b1, w2, b2 = init_params(kp, input_dim, hidden_dim, output_dim)

    # One-time weight prep (hoisted out of the per-call path).
    padded_params, O = prepare_timenet_params(w1, b1, w2, b2)

    out = timenet_forward(t, padded_params, O, tile_b=1024)
    out = jax.block_until_ready(out)

    # reference check in plain JAX
    ref = jnp.maximum(jnp.maximum(t @ w1 + b1, 0.0) @ w2 + b2, 0.0)
    assert out.shape == (batch, output_dim)
    assert jnp.allclose(out, ref, atol=1e-5, rtol=1e-5)

    print("KERNEL_OK")
</pallas_src>

<mosaic_0001>
module attributes {stable_mosaic.version = 11 : i64} {
  func.func @timenet_kernel(%arg0: i32, %arg1: memref<152x1xf32, #tpu.memory_space<vmem>>, %arg2: memref<1x128xf32, #tpu.memory_space<vmem>>, %arg3: memref<1x128xf32, #tpu.memory_space<vmem>>, %arg4: memref<128x128xf32, #tpu.memory_space<vmem>>, %arg5: memref<1x128xf32, #tpu.memory_space<vmem>>, %arg6: memref<152x16xf32, #tpu.memory_space<vmem>>) attributes {dimension_semantics = [#tpu.dimension_semantics<parallel>], iteration_bounds = array<i64: 2>, scalar_prefetch = 0 : i64, scratch_operands = 0 : i64, tpu.core_type = #tpu.core_type<tc>, window_params = [{transform_indices = @transform_0, window_bounds = array<i64: 152, 1>}, {pipeline_mode = #tpu.pipeline_mode<synchronous>, transform_indices = @transform_1, window_bounds = array<i64: 1, 128>}, {pipeline_mode = #tpu.pipeline_mode<synchronous>, transform_indices = @transform_2, window_bounds = array<i64: 1, 128>}, {pipeline_mode = #tpu.pipeline_mode<synchronous>, transform_indices = @transform_3, window_bounds = array<i64: 128, 128>}, {pipeline_mode = #tpu.pipeline_mode<synchronous>, transform_indices = @transform_4, window_bounds = array<i64: 1, 128>}, {transform_indices = @transform_5, window_bounds = array<i64: 152, 16>}]} {
    %c0 = arith.constant 0 : index
    %c0_0 = arith.constant 0 : index
    %0 = vector.load %arg1[%c0, %c0_0] : memref<152x1xf32, #tpu.memory_space<vmem>>, vector<152x1xf32>
    %c0_1 = arith.constant 0 : index
    %c0_2 = arith.constant 0 : index
    %1 = vector.load %arg2[%c0_1, %c0_2] : memref<1x128xf32, #tpu.memory_space<vmem>>, vector<1x128xf32>
    %2 = vector.broadcast %0 : vector<152x1xf32> to vector<152x128xf32>
    %3 = vector.broadcast %1 : vector<1x128xf32> to vector<152x128xf32>
    %4 = arith.mulf %2, %3 : vector<152x128xf32>
    %c0_3 = arith.constant 0 : index
    %c0_4 = arith.constant 0 : index
    %5 = vector.load %arg3[%c0_3, %c0_4] : memref<1x128xf32, #tpu.memory_space<vmem>>, vector<1x128xf32>
    %6 = vector.broadcast %5 : vector<1x128xf32> to vector<152x128xf32>
    %7 = arith.addf %4, %6 : vector<152x128xf32>
    %cst = arith.constant 0.000000e+00 : f32
    %8 = vector.broadcast %cst : f32 to vector<152x128xf32>
    %9 = arith.maximumf %7, %8 : vector<152x128xf32>
    %c0_5 = arith.constant 0 : index
    %c0_6 = arith.constant 0 : index
    %10 = vector.load %arg4[%c0_5, %c0_6] : memref<128x128xf32, #tpu.memory_space<vmem>>, vector<128x128xf32>
    %cst_7 = arith.constant dense<0.000000e+00> : vector<152x128xf32>
    %11 = tpu.matmul %9, %10, %cst_7 {dimension_numbers = #tpu.dot_dimension_numbers<[1], [0], [0], [1], [0, 0, 1, 1], [], []>} : vector<152x128xf32>, vector<128x128xf32>, vector<152x128xf32> -> vector<152x128xf32>
    %c0_8 = arith.constant 0 : index
    %c0_9 = arith.constant 0 : index
    %12 = vector.load %arg5[%c0_8, %c0_9] : memref<1x128xf32, #tpu.memory_space<vmem>>, vector<1x128xf32>
    %13 = vector.broadcast %12 : vector<1x128xf32> to vector<152x128xf32>
    %14 = arith.addf %11, %13 : vector<152x128xf32>
    %cst_10 = arith.constant 0.000000e+00 : f32
    %15 = vector.broadcast %cst_10 : f32 to vector<152x128xf32>
    %16 = arith.maximumf %14, %15 : vector<152x128xf32>
    %17 = vector.extract_strided_slice %16 {offsets = [0, 0], sizes = [152, 16], strides = [1, 1]} : vector<152x128xf32> to vector<152x16xf32>
    %c0_11 = arith.constant 0 : index
    %c0_12 = arith.constant 0 : index
    %18 = vector.load %arg6[%c0_11, %c0_12] : memref<152x16xf32, #tpu.memory_space<vmem>>, vector<152x16xf32>
    tpu.vector_store %arg6[%c0_11, %c0_12], %17 {strides = array<i32>} : memref<152x16xf32, #tpu.memory_space<vmem>>, vector<152x16xf32>,
    return
  }
  func.func @transform_0(%arg0: i32) -> (i32, i32) {
    %c0_i32 = arith.constant 0 : i32
    %c0_i32_0 = arith.constant 0 : i32
    return %arg0, %c0_i32 : i32, i32
  }
  func.func @transform_1(%arg0: i32) -> (i32, i32) {
    %c0_i32 = arith.constant 0 : i32
    %c0_i32_0 = arith.constant 0 : i32
    %c0_i32_1 = arith.constant 0 : i32
    return %c0_i32, %c0_i32_0 : i32, i32
  }
  func.func @transform_2(%arg0: i32) -> (i32, i32) {
    %c0_i32 = arith.constant 0 : i32
    %c0_i32_0 = arith.constant 0 : i32
    %c0_i32_1 = arith.constant 0 : i32
    return %c0_i32, %c0_i32_0 : i32, i32
  }
  func.func @transform_3(%arg0: i32) -> (i32, i32) {
    %c0_i32 = arith.constant 0 : i32
    %c0_i32_0 = arith.constant 0 : i32
    %c0_i32_1 = arith.constant 0 : i32
    return %c0_i32, %c0_i32_0 : i32, i32
  }
  func.func @transform_4(%arg0: i32) -> (i32, i32) {
    %c0_i32 = arith.constant 0 : i32
    %c0_i32_0 = arith.constant 0 : i32
    %c0_i32_1 = arith.constant 0 : i32
    return %c0_i32, %c0_i32_0 : i32, i32
  }
  func.func @transform_5(%arg0: i32) -> (i32, i32) {
    %c0_i32 = arith.constant 0 : i32
    %c0_i32_0 = arith.constant 0 : i32
    return %arg0, %c0_i32 : i32, i32
  }
}

</mosaic_0001>

<bundles_post_ra>
// kernel: tpu_custom_call.1
= control target key start
LH: loop header
LB: loop body
LE: loop exit
PB: predicated region body
PF: predicated region fallthrough
CT: control target
= control target key end

     0   :  { %s923_s18 = smov 0   ;;  %s1182_s0 = inlined_call_operand.vmem [shape: f32[300,1], index: 0, kind: input, shape index: {}]   ;;  %s1183_s1 = inlined_call_operand.vmem [shape: f32[1,128], index: 1, kind: input, shape index: {}]   ;;  %s1184_s2 = inlined_call_operand.vmem [shape: f32[1,128], index: 2, kind: input, shape index: {}]   ;;  %s1185_s3 = inlined_call_operand.vmem [shape: f32[128,128], index: 3, kind: input, shape index: {}]   ;;  %s1186_s4 = inlined_call_operand.vmem [shape: f32[1,128], index: 4, kind: input, shape index: {}]   ;;  %s1187_s5 = inlined_call_operand.vmem [shape: f32[300,16], index: 5, kind: output, shape index: {}]  }
   0x1 LB: > { %s691_s19 = sadd.s32 4294967295, %s887_s18   ;;  %p695_p0 = scmp.ge.s32.totalorder %s887_s18, 1  ;;  %s887_s18 = sphi %s923_s18, %s15_s18  }
   0x2   : > { %p188_p1 = scmp.lt.s32.totalorder %s887_s18, 3 }
   0x4   : > { %p189_p2 = pnand %p695_p0, %p188_p1 }
   0x5   : > { %s216_s20 = smul.u32 (!%p189_p2), 19, %s691_s19  ;;  %v413_v0 = vld [vmem:[%s1185_s3] sm:$0xff] (!%p189_p2)  ;;  %v414_v1 = vld [vmem:[%s1185_s3 + $0x8] sm:$0xff] (!%p189_p2)  ;;  %v415_v2 = vld [vmem:[%s1185_s3 + $0x10] sm:$0xff] (!%p189_p2)  ;;  %v889_v3 = vmov (!%p189_p2), 0   ;;  %v890_v6 = vmov (!%p189_p2), 0.0|0.0  }
   0x6   : > { %192 = sbr.rel (%p189_p2) target bundleno = 404 (0x194), region = 40  ;;  %880 = vset.pattern.permute.xlu1 (!%p189_p2), %v889_v3  ;;  %879 = vset.pattern.permute.xlu0 (!%p189_p2), %v889_v3  ;;  %v828_v4 = vpack.c.bf16 (!%p189_p2), %v414_v1, %v413_v0  ;;  %v416_v5 = vld [vmem:[%s1185_s3 + $0x18] sm:$0xff] (!%p189_p2)  ;;  %v417_v8 = vld [vmem:[%s1185_s3 + $0x20] sm:$0xff] (!%p189_p2)  ;;  %v418_v9 = vld [vmem:[%s1185_s3 + $0x28] sm:$0xff] (!%p189_p2)  ;;  %vm891_vm0 = vmmov (!%p189_p2), 0   ;;  %v892_v22 = vmov (!%p189_p2), 0.0  }
   0x7   : > { %p217_p3 = scmp.lt.s32.totalorder (!%p189_p2), %s216_s20, 37  ;;  %827 = vmatprep.subr.bf16.mxu0 (!%p189_p2), %v890_v6  ;;  %851 = vmatprep.subr.bf16.mxu1 (!%p189_p2), %v890_v6  ;;  %v831_v7 = vpack.c.bf16 (!%p189_p2), %v416_v5, %v415_v2  ;;  %v834_v10 = vpack.c.bf16 (!%p189_p2), %v418_v9, %v417_v8  ;;  %v419_v11 = vld [vmem:[%s1185_s3 + $0x30] sm:$0xff] (!%p189_p2)  ;;  %v420_v14 = vld [vmem:[%s1185_s3 + $0x38] sm:$0xff] (!%p189_p2)  ;;  %v421_v18 = vld [vmem:[%s1185_s3 + $0x40] sm:$0xff] (!%p189_p2)  ;;  %vm615_vm1 = vcmask (!%p189_p2), 130048  }
   0x8   : > { %829 = vmatpush3.bf16.msra.mxu0 (!%p189_p2), %v828_v4  ;;  %859 = vmatpush3.bf16.msra.mxu1 (!%p189_p2), %v828_v4  ;;  %v837_v17 = vpack.c.bf16 (!%p189_p2), %v420_v14, %v419_v11  ;;  %v422_v19 = vld [vmem:[%s1185_s3 + $0x48] sm:$0xff] (!%p189_p2)  ;;  %v423_v24 = vld [vmem:[%s1185_s3 + $0x50] sm:$0xff] (!%p189_p2)  ;;  %v424_v25 = vld [vmem:[%s1185_s3 + $0x58] sm:$0xff] (!%p189_p2) }
   0x9   : > { %830 = vmatprep.subr.bf16.mxu0 (!%p189_p2), %v890_v6  ;;  %852 = vmatprep.subr.bf16.mxu1 (!%p189_p2), %v890_v6  ;;  %v840_v23 = vpack.c.bf16 (!%p189_p2), %v422_v19, %v421_v18  ;;  %v843_v28 = vpack.c.bf16 (!%p189_p2), %v424_v25, %v423_v24  ;;  %v425_v29 = vld [vmem:[%s1185_s3 + $0x60] sm:$0xff] (!%p189_p2)  ;;  %v426_v30 = vld [vmem:[%s1185_s3 + $0x68] sm:$0xff] (!%p189_p2)  ;;  %v427_v34 = vld [vmem:[%s1185_s3 + $0x70] sm:$0xff] (!%p189_p2) }
   0xa   : > { %770 = vmatprep.mubr.msk.f32.mxu0 (!%p189_p2), %vm891_vm0, %v892_v22  ;;  %800 = vmatprep.mubr.msk.f32.mxu1 (!%p189_p2), %vm891_vm0, %v892_v22  ;;  %v846_v33 = vpack.c.bf16 (!%p189_p2), %v426_v30, %v425_v29  ;;  %v428_v35 = vld [vmem:[%s1185_s3 + $0x78] sm:$0xff] (!%p189_p2)  ;;  %v1031_v46 = vld [vmem:[%s1183_s1] ss:$0 sm:$0xff] (!%p189_p2) }
   0xb   : > { %v849_v38 = vpack.c.bf16 (!%p189_p2), %v428_v35, %v427_v34  ;;  %v1036_v47 = vld [vmem:[%s1184_s2] ss:$0 sm:$0xff] (!%p189_p2) }
   0xc   : > { %832 = vmatpush3.bf16.msra.mxu0 (!%p189_p2), %v831_v7  ;;  %860 = vmatpush3.bf16.msra.mxu1 (!%p189_p2), %v831_v7 }
   0xd   : > { %s1189_s20 = smov (!%p217_p3, %s216_s20), 37  ;;  %833 = vmatprep.subr.bf16.mxu0 %v890_v6  ;;  %853 = vmatprep.subr.bf16.mxu1 %v890_v6 }
   0xe   : > { %s696_s8 = sshll.u32 %s1189_s20, 3 }
   0xf   : > { %s961_s11 = scalar_lea.vmem %s1182_s0, %s696_s8  ;;  %s1122_s19 = scalar_lea.vmem %s1187_s5, %s696_s8 }
  0x10   : > { %v238_v12 = vld [vmem:[%s961_s11 + $0x50] sm:$0xff]  ;;  %v228_v13 = vld [vmem:[%s961_s11] sm:$0xff]  ;;  %v229_v16 = vld [vmem:[%s961_s11 + $0x8] sm:$0xff]  ;;  %835 = vmatpush3.bf16.msra.mxu0 %v834_v10  ;;  %861 = vmatpush3.bf16.msra.mxu1 %v834_v10 }
  0x11   : > { %300 = vperm.xlu1 %880, %v238_v12   ;;  %250 = vperm.xlu0 %879, %v228_v13   ;;  %v230_v15 = vld [vmem:[%s961_s11 + $0x10] sm:$0xff]  ;;  %v231_v20 = vld [vmem:[%s961_s11 + $0x18] sm:$0xff]  ;;  %v232_v26 = vld [vmem:[%s961_s11 + $0x20] sm:$0xff] }
  0x12   : > { %836 = vmatprep.subr.bf16.mxu0 %v890_v6  ;;  %854 = vmatprep.subr.bf16.mxu1 %v890_v6  ;;  %v239_v21 = vld [vmem:[%s961_s11 + $0x58] sm:$0xff]  ;;  %v240_v27 = vld [vmem:[%s961_s11 + $0x60] sm:$0xff]  ;;  %v233_v31 = vld [vmem:[%s961_s11 + $0x28] sm:$0xff] }
  0x13   : > { %v241_v32 = vld [vmem:[%s961_s11 + $0x68] sm:$0xff]  ;;  %v234_v36 = vld [vmem:[%s961_s11 + $0x30] sm:$0xff]  ;;  %v235_v39 = vld [vmem:[%s961_s11 + $0x38] sm:$0xff] }
  0x14   : > { %838 = vmatpush3.bf16.msra.mxu0 %v837_v17  ;;  %862 = vmatpush3.bf16.msra.mxu1 %v837_v17  ;;  %v242_v37 = vld [vmem:[%s961_s11 + $0x70] sm:$0xff]  ;;  %v243_v40 = vld [vmem:[%s961_s11 + $0x78] sm:$0xff]  ;;  %v236_v41 = vld [vmem:[%s961_s11 + $0x40] sm:$0xff] }
  0x15   : > { %260 = vperm.xlu1 %880, %v230_v15   ;;  %255 = vperm.xlu0 %879, %v229_v16   ;;  %v244_v42 = vld [vmem:[%s961_s11 + $0x80] sm:$0xff]  ;;  %v237_v43 = vld [vmem:[%s961_s11 + $0x48] sm:$0xff]  ;;  %v246_v45 = vld [vmem:[%s961_s11 + $0x90] sm:$0xff] }
  0x16   : > { %839 = vmatprep.subr.bf16.mxu0 %v890_v6  ;;  %855 = vmatprep.subr.bf16.mxu1 %v890_v6  ;;  %v245_v44 = vld [vmem:[%s961_s11 + $0x88] sm:$0xff] }
  0x18   : > { %841 = vmatpush3.bf16.msra.mxu0 %v840_v23  ;;  %863 = vmatpush3.bf16.msra.mxu1 %v840_v23 }
  0x19   : > { %265 = vperm.xlu1 %880, %v231_v20   ;;  %305 = vperm.xlu0 %879, %v239_v21  }
  0x1a   : > { %842 = vmatprep.subr.bf16.mxu0 %v890_v6  ;;  %856 = vmatprep.subr.bf16.mxu1 %v890_v6 }
  0x1c   : > { %844 = vmatpush3.bf16.msra.mxu0 %v843_v28  ;;  %864 = vmatpush3.bf16.msra.mxu1 %v843_v28 }
  0x1d   : > { %270 = vperm.xlu1 %880, %v232_v26   ;;  %310 = vperm.xlu0 %879, %v240_v27  }
  0x1e   : > { %845 = vmatprep.subr.bf16.mxu0 %v890_v6  ;;  %857 = vmatprep.subr.bf16.mxu1 %v890_v6 }
  0x20   : > { %847 = vmatpush3.bf16.msra.mxu0 %v846_v33  ;;  %865 = vmatpush3.bf16.msra.mxu1 %v846_v33 }
  0x21   : > { %275 = vperm.xlu1 %880, %v233_v31   ;;  %315 = vperm.xlu0 %879, %v241_v32  }
  0x22   : > { %848 = vmatprep.subr.bf16.mxu0 %v890_v6  ;;  %858 = vmatprep.subr.bf16.mxu1 %v890_v6 }
  0x24   : > { %850 = vmatpush3.bf16.msra.mxu0 %v849_v38  ;;  %866 = vmatpush3.bf16.msra.mxu1 %v849_v38 }
  0x25   : > { %280 = vperm.xlu1 %880, %v234_v36   ;;  %320 = vperm.xlu0 %879, %v242_v37  }
  0x29   : > { %285 = vperm.xlu1 %880, %v235_v39   ;;  %325 = vperm.xlu0 %879, %v243_v40  }
  0x2d   : > { %290 = vperm.xlu1 %880, %v236_v41   ;;  %330 = vperm.xlu0 %879, %v244_v42  }
  0x31   : > { %295 = vperm.xlu1 %880, %v237_v43   ;;  %335 = vperm.xlu0 %879, %v245_v44  }
  0x35   : > { %340 = vperm.xlu0 %879, %v246_v45  }
  0x90   : > { %v301_v48 = vpop.permute.xlu1 %300  ;;  %v251_v49 = vpop.permute.xlu0 %250 }
  0x91   : > { %v359_v50 = vmul.f32 %v1031_v46, %v301_v48  ;;  %v349_v51 = vmul.f32 %v1031_v46, %v251_v49 }
  0x93   : > { %v385_v52 = vadd.f32 %v1036_v47, %v359_v50  ;;  %v375_v53 = vadd.f32 %v1036_v47, %v349_v51 }
  0x94   : > { %v261_v54 = vpop.permute.xlu1 %260  ;;  %v256_v55 = vpop.permute.xlu0 %255 }
  0x95   : > { %v404_v56 = vmax.f32 %v385_v52, 0.0  ;;  %v394_v57 = vmax.f32 %v375_v53, 0.0  ;;  %v351_v58 = vmul.f32 %v1031_v46, %v261_v54  ;;  %v350_v59 = vmul.f32 %v1031_v46, %v256_v55 }
  0x97   : > { %v376_v60 = vadd.f32 %v1036_v47, %v350_v59  ;;  %771 = vmatmul.mubr.f32.vlgmr.msra.gmra.mrb[0].mxu0 %v394_v57  ;;  %801 = vmatmul.mubr.f32.vlgmr.msra.gmra.mrb[0].mxu1 %v404_v56  ;;  %v377_v63 = vadd.f32 %v1036_v47, %v351_v58 }
  0x98   : > { %v266_v61 = vpop.permute.xlu1 %265  ;;  %v306_v62 = vpop.permute.xlu0 %305  ;;  %773 = vmatprep.mubr.msk.f32.mxu0 %vm891_vm0, %v892_v22  ;;  %803 = vmatprep.mubr.msk.f32.mxu1 %vm891_vm0, %v892_v22 }
  0x99   : > { %v395_v0 = vmax.f32 %v376_v60, 0.0  ;;  %v352_v1 = vmul.f32 %v1031_v46, %v266_v61  ;;  %v360_v2 = vmul.f32 %v1031_v46, %v306_v62  ;;  %v396_v7 = vmax.f32 %v377_v63, 0.0  ;;  %v1113_v63 = vld [vmem:[%s1186_s4] ss:$0 sm:$0xff] }
  0x9b   : > { %v386_v3 = vadd.f32 %v1036_v47, %v360_v2  ;;  %774 = vmatmul.mubr.f32.gmra.mrb[2].mxu0 %v395_v0  ;;  %v378_v4 = vadd.f32 %v1036_v47, %v352_v1 }
  0x9c   : > { %v271_v5 = vpop.permute.xlu1 %270  ;;  %v311_v6 = vpop.permute.xlu0 %310  ;;  %776 = vmatprep.mubr.msk.f32.mxu0 %vm891_vm0, %v892_v22 }
  0x9d   : > { %v405_v8 = vmax.f32 %v386_v3, 0.0  ;;  %v353_v9 = vmul.f32 %v1031_v46, %v271_v5  ;;  %v361_v10 = vmul.f32 %v1031_v46, %v311_v6  ;;  %v397_v12 = vmax.f32 %v378_v4, 0.0 }
  0x9f   : > { %v387_v11 = vadd.f32 %v1036_v47, %v361_v10  ;;  %777 = vmatmul.mubr.f32.gmra.mrb[4].mxu0 %v396_v7  ;;  %804 = vmatmul.mubr.f32.gmra.mrb[2].mxu1 %v405_v8  ;;  %v379_v15 = vadd.f32 %v1036_v47, %v353_v9 }
  0xa0   : > { %v276_v13 = vpop.permute.xlu1 %275  ;;  %v316_v14 = vpop.permute.xlu0 %315  ;;  %779 = vmatprep.mubr.msk.f32.mxu0 %vm891_vm0, %v892_v22  ;;  %806 = vmatprep.mubr.msk.f32.mxu1 %vm891_vm0, %v892_v22 }
  0xa1   : > { %v406_v16 = vmax.f32 %v387_v11, 0.0  ;;  %v354_v17 = vmul.f32 %v1031_v46, %v276_v13  ;;  %v362_v18 = vmul.f32 %v1031_v46, %v316_v14  ;;  %v398_v24 = vmax.f32 %v379_v15, 0.0 }
  0xa3   : > { %v388_v19 = vadd.f32 %v1036_v47, %v362_v18  ;;  %780 = vmatmul.mubr.f32.gmra.mrb[6].mxu0 %v397_v12  ;;  %807 = vmatmul.mubr.f32.gmra.mrb[4].mxu1 %v406_v16  ;;  %v380_v20 = vadd.f32 %v1036_v47, %v354_v17 }
  0xa4   : > { %v281_v21 = vpop.permute.xlu1 %280  ;;  %v321_v23 = vpop.permute.xlu0 %320  ;;  %782 = vmatprep.mubr.msk.f32.mxu0 %vm891_vm0, %v892_v22  ;;  %809 = vmatprep.mubr.msk.f32.mxu1 %vm891_vm0, %v892_v22 }
  0xa5   : > { %v407_v25 = vmax.f32 %v388_v19, 0.0  ;;  %v355_v26 = vmul.f32 %v1031_v46, %v281_v21  ;;  %v363_v27 = vmul.f32 %v1031_v46, %v321_v23  ;;  %v399_v29 = vmax.f32 %v380_v20, 0.0 }
  0xa7   : > { %v389_v28 = vadd.f32 %v1036_v47, %v363_v27  ;;  %783 = vmatmul.mubr.f32.gmra.mrb[8].mxu0 %v398_v24  ;;  %810 = vmatmul.mubr.f32.gmra.mrb[6].mxu1 %v407_v25  ;;  %v381_v32 = vadd.f32 %v1036_v47, %v355_v26 }
  0xa8   : > { %v286_v30 = vpop.permute.xlu1 %285  ;;  %v326_v31 = vpop.permute.xlu0 %325  ;;  %785 = vmatprep.mubr.msk.f32.mxu0 %vm891_vm0, %v892_v22  ;;  %812 = vmatprep.mubr.msk.f32.mxu1 %vm891_vm0, %v892_v22 }
  0xa9   : > { %v408_v33 = vmax.f32 %v389_v28, 0.0  ;;  %v356_v34 = vmul.f32 %v1031_v46, %v286_v30  ;;  %v364_v35 = vmul.f32 %v1031_v46, %v326_v31  ;;  %v400_v40 = vmax.f32 %v381_v32, 0.0 }
  0xab   : > { %v390_v36 = vadd.f32 %v1036_v47, %v364_v35  ;;  %786 = vmatmul.mubr.f32.gmra.mrb[10].mxu0 %v399_v29  ;;  %813 = vmatmul.mubr.f32.gmra.mrb[8].mxu1 %v408_v33  ;;  %v382_v37 = vadd.f32 %v1036_v47, %v356_v34 }
  0xac   : > { %v291_v38 = vpop.permute.xlu1 %290  ;;  %v331_v39 = vpop.permute.xlu0 %330  ;;  %788 = vmatprep.mubr.msk.f32.mxu0 %vm891_vm0, %v892_v22  ;;  %815 = vmatprep.mubr.msk.f32.mxu1 %vm891_vm0, %v892_v22 }
  0xad   : > { %v409_v41 = vmax.f32 %v390_v36, 0.0  ;;  %v357_v42 = vmul.f32 %v1031_v46, %v291_v38  ;;  %v365_v43 = vmul.f32 %v1031_v46, %v331_v39  ;;  %v401_v45 = vmax.f32 %v382_v37, 0.0 }
  0xaf   : > { %v391_v44 = vadd.f32 %v1036_v47, %v365_v43  ;;  %789 = vmatmul.mubr.f32.gmra.mrb[12].mxu0 %v400_v40  ;;  %816 = vmatmul.mubr.f32.gmra.mrb[10].mxu1 %v409_v41  ;;  %v383_v50 = vadd.f32 %v1036_v47, %v357_v42 }
  0xb0   : > { %v296_v48 = vpop.permute.xlu1 %295  ;;  %v336_v49 = vpop.permute.xlu0 %335  ;;  %791 = vmatprep.mubr.msk.f32.mxu0 %vm891_vm0, %v892_v22  ;;  %818 = vmatprep.mubr.msk.f32.mxu1 %vm891_vm0, %v892_v22 }
  0xb1   : > { %v410_v51 = vmax.f32 %v391_v44, 0.0  ;;  %v358_v52 = vmul.f32 %v1031_v46, %v296_v48  ;;  %v366_v53 = vmul.f32 %v1031_v46, %v336_v49  ;;  %v402_v56 = vmax.f32 %v383_v50, 0.0 }
  0xb3   : > { %v392_v54 = vadd.f32 %v1036_v47, %v366_v53  ;;  %792 = vmatmul.mubr.f32.gmra.mrb[14].mxu0 %v401_v45  ;;  %819 = vmatmul.mubr.f32.gmra.mrb[12].mxu1 %v410_v51  ;;  %v384_v57 = vadd.f32 %v1036_v47, %v358_v52 }
  0xb4   : > { %v341_v55 = vpop.permute.xlu0 %340  ;;  %794 = vmatprep.mubr.msk.f32.mxu0 %vm891_vm0, %v892_v22  ;;  %821 = vmatprep.mubr.msk.f32.mxu1 %vm891_vm0, %v892_v22 }
  0xb5   : > { %v411_v58 = vmax.f32 %v392_v54, 0.0  ;;  %v367_v59 = vmul.f32 %v1031_v46, %v341_v55  ;;  %v403_v61 = vmax.f32 %v384_v57, 0.0 }
  0xb7   : > { %v393_v60 = vadd.f32 %v1036_v47, %v367_v59  ;;  %795 = vmatmul.mubr.f32.gmra.mrb[16].mxu0 %v402_v56  ;;  %822 = vmatmul.mubr.f32.gmra.mrb[14].mxu1 %v411_v58 }
  0xb8   : > { %797 = vmatprep.mubr.msk.f32.mxu0 %vm891_vm0, %v892_v22  ;;  %824 = vmatprep.mubr.msk.f32.mxu1 %vm891_vm0, %v892_v22 }
  0xb9   : > { %v412_v62 = vmax.f32 %v393_v60, 0.0 }
  0xbb   : > { %798 = vmatmul.mubr.f32.gmra.mrb[18].mxu0 %v403_v61  ;;  %825 = vmatmul.mubr.f32.gmra.mrb[16].mxu1 %v412_v62 }
 0x16a   : > { %v502_v46 = vpop.f32.mrb[0].mxu0  ;;  %v552_v47 = vpop.f32.mrb[0].mxu1 }
 0x16b   : > { %v503_v0 = vadd.f32 %v1113_v63, %v502_v46  ;;  %v772_v1 = vpop.f32.mrb[1].mxu0  ;;  %v553_v2 = vadd.f32 %v1113_v63, %v552_v47  ;;  %v802_v3 = vpop.f32.mrb[1].mxu1 }
 0x16d   : > { %v596_v22 = vmax.f32 %v503_v0, 0.0  ;;  %v606_v4 = vmax.f32 %v553_v2, 0.0 }
 0x16e   : > { %v507_v5 = vpop.f32.mrb[2].mxu0 }
 0x16f   : > { %616 = vst.msk [vmem:[%s1122_s19] sm:$0xff] %vm615_vm1, %v596_v22  ;;  %626 = vst.msk [vmem:[%s1122_s19 + $0x50] sm:$0xff] %vm615_vm1, %v606_v4  ;;  %v508_v6 = vadd.f32 %v1113_v63, %v507_v5  ;;  %v775_v7 = vpop.f32.mrb[3].mxu0 }
 0x171   : > { %v597_v8 = vmax.f32 %v508_v6, 0.0 }
 0x172   : > { %v512_v9 = vpop.f32.mrb[4].mxu0  ;;  %v557_v10 = vpop.f32.mrb[2].mxu1 }
 0x173   : > { %617 = vst.msk [vmem:[%s1122_s19 + $0x8] sm:$0xff] %vm615_vm1, %v597_v8  ;;  %v513_v11 = vadd.f32 %v1113_v63, %v512_v9  ;;  %v558_v12 = vadd.f32 %v1113_v63, %v557_v10  ;;  %v778_v13 = vpop.f32.mrb[5].mxu0  ;;  %v805_v14 = vpop.f32.mrb[3].mxu1 }
 0x175   : > { %v598_v15 = vmax.f32 %v513_v11, 0.0  ;;  %v607_v16 = vmax.f32 %v558_v12, 0.0 }
 0x176   : > { %v517_v17 = vpop.f32.mrb[6].mxu0  ;;  %v562_v18 = vpop.f32.mrb[4].mxu1 }
 0x177   : > { %618 = vst.msk [vmem:[%s1122_s19 + $0x10] sm:$0xff] %vm615_vm1, %v598_v15  ;;  %627 = vst.msk [vmem:[%s1122_s19 + $0x58] sm:$0xff] %vm615_vm1, %v607_v16  ;;  %v518_v19 = vadd.f32 %v1113_v63, %v517_v17  ;;  %v563_v20 = vadd.f32 %v1113_v63, %v562_v18  ;;  %v781_v21 = vpop.f32.mrb[7].mxu0  ;;  %v808_v23 = vpop.f32.mrb[5].mxu1 }
 0x179   : > { %v599_v24 = vmax.f32 %v518_v19, 0.0  ;;  %v608_v25 = vmax.f32 %v563_v20, 0.0 }
 0x17a   : > { %v522_v26 = vpop.f32.mrb[8].mxu0  ;;  %v567_v27 = vpop.f32.mrb[6].mxu1 }
 0x17b   : > { %619 = vst.msk [vmem:[%s1122_s19 + $0x18] sm:$0xff] %vm615_vm1, %v599_v24  ;;  %628 = vst.msk [vmem:[%s1122_s19 + $0x60] sm:$0xff] %vm615_vm1, %v608_v25  ;;  %v523_v28 = vadd.f32 %v1113_v63, %v522_v26  ;;  %v568_v29 = vadd.f32 %v1113_v63, %v567_v27  ;;  %v784_v30 = vpop.f32.mrb[9].mxu0  ;;  %v811_v31 = vpop.f32.mrb[7].mxu1 }
 0x17d   : > { %v600_v32 = vmax.f32 %v523_v28, 0.0  ;;  %v609_v33 = vmax.f32 %v568_v29, 0.0 }
 0x17e   : > { %v527_v34 = vpop.f32.mrb[10].mxu0  ;;  %v572_v35 = vpop.f32.mrb[8].mxu1 }
 0x17f   : > { %620 = vst.msk [vmem:[%s1122_s19 + $0x20] sm:$0xff] %vm615_vm1, %v600_v32  ;;  %629 = vst.msk [vmem:[%s1122_s19 + $0x68] sm:$0xff] %vm615_vm1, %v609_v33  ;;  %v528_v36 = vadd.f32 %v1113_v63, %v527_v34  ;;  %v573_v37 = vadd.f32 %v1113_v63, %v572_v35  ;;  %v787_v38 = vpop.f32.mrb[11].mxu0  ;;  %v814_v39 = vpop.f32.mrb[9].mxu1 }
 0x181   : > { %v601_v40 = vmax.f32 %v528_v36, 0.0  ;;  %v610_v41 = vmax.f32 %v573_v37, 0.0 }
 0x182   : > { %v532_v42 = vpop.f32.mrb[12].mxu0  ;;  %v577_v43 = vpop.f32.mrb[10].mxu1 }
 0x183   : > { %621 = vst.msk [vmem:[%s1122_s19 + $0x28] sm:$0xff] %vm615_vm1, %v601_v40  ;;  %630 = vst.msk [vmem:[%s1122_s19 + $0x70] sm:$0xff] %vm615_vm1, %v610_v41  ;;  %v533_v44 = vadd.f32 %v1113_v63, %v532_v42  ;;  %v578_v45 = vadd.f32 %v1113_v63, %v577_v43  ;;  %v790_v48 = vpop.f32.mrb[13].mxu0  ;;  %v817_v49 = vpop.f32.mrb[11].mxu1 }
 0x185   : > { %v602_v50 = vmax.f32 %v533_v44, 0.0  ;;  %v611_v51 = vmax.f32 %v578_v45, 0.0 }
 0x186   : > { %v537_v52 = vpop.f32.mrb[14].mxu0  ;;  %v582_v53 = vpop.f32.mrb[12].mxu1 }
 0x187   : > { %622 = vst.msk [vmem:[%s1122_s19 + $0x30] sm:$0xff] %vm615_vm1, %v602_v50  ;;  %631 = vst.msk [vmem:[%s1122_s19 + $0x78] sm:$0xff] %vm615_vm1, %v611_v51  ;;  %v538_v54 = vadd.f32 %v1113_v63, %v537_v52  ;;  %v583_v55 = vadd.f32 %v1113_v63, %v582_v53  ;;  %v793_v56 = vpop.f32.mrb[15].mxu0  ;;  %v820_v57 = vpop.f32.mrb[13].mxu1 }
 0x189   : > { %v603_v58 = vmax.f32 %v538_v54, 0.0  ;;  %v612_v59 = vmax.f32 %v583_v55, 0.0 }
 0x18a   : > { %v542_v60 = vpop.f32.mrb[16].mxu0  ;;  %v587_v61 = vpop.f32.mrb[14].mxu1 }
 0x18b   : > { %623 = vst.msk [vmem:[%s1122_s19 + $0x38] sm:$0xff] %vm615_vm1, %v603_v58  ;;  %632 = vst.msk [vmem:[%s1122_s19 + $0x80] sm:$0xff] %vm615_vm1, %v612_v59  ;;  %v543_v62 = vadd.f32 %v1113_v63, %v542_v60  ;;  %v588_v46 = vadd.f32 %v1113_v63, %v587_v61  ;;  %v796_v47 = vpop.f32.mrb[17].mxu0  ;;  %v823_v0 = vpop.f32.mrb[15].mxu1 }
 0x18d   : > { %v604_v1 = vmax.f32 %v543_v62, 0.0  ;;  %v613_v2 = vmax.f32 %v588_v46, 0.0 }
 0x18e   : > { %v547_v3 = vpop.f32.mrb[18].mxu0  ;;  %v592_v22 = vpop.f32.mrb[16].mxu1 }
 0x18f   : > { %624 = vst.msk [vmem:[%s1122_s19 + $0x40] sm:$0xff] %vm615_vm1, %v604_v1  ;;  %633 = vst.msk [vmem:[%s1122_s19 + $0x88] sm:$0xff] %vm615_vm1, %v613_v2  ;;  %v548_v4 = vadd.f32 %v1113_v63, %v547_v3  ;;  %v593_v5 = vadd.f32 %v1113_v63, %v592_v22  ;;  %v799_v6 = vpop.f32.mrb[19].mxu0  ;;  %v826_v7 = vpop.f32.mrb[17].mxu1 }
 0x191   : > { %v605_v8 = vmax.f32 %v548_v4, 0.0  ;;  %v614_v9 = vmax.f32 %v593_v5, 0.0 }
 0x193   : > { %625 = vst.msk [vmem:[%s1122_s19 + $0x48] sm:$0xff] %vm615_vm1, %v605_v8  ;;  %634 = vst.msk [vmem:[%s1122_s19 + $0x90] sm:$0xff] %vm615_vm1, %v614_v9 }
 0x194 PF: > { %s15_s18 = sadd.s32 1, %s887_s18  }
 0x195   : > { %p12_p4 = scmp.ge.s32.totalorder %s15_s18, 4  }
 0x197   :  { %14 = sbr.rel (!%p12_p4) target bundleno = 1 (0x1), region = 70 }

</bundles_post_ra>
